<compile_context>
chip_gen: v7x
topology: tpu7x:2x2x1
jax: 0.10.0
libtpu: 0.0.40
codegen_flags: <defaults>
</compile_context>

<pallas_src>
import jax
import jax.numpy as jnp
from jax.experimental import pallas as pl
from jax.experimental.pallas import tpu as pltpu


# Packed weight slab (96, 128) f32 — all slices 8-sublane aligned:
#   rows  0:16  cols 0:16  fc1^T            (rows 13:16 zero; x padded to 16)
#   rows 16:32  cols 0:64  W_ih^T           gate order i, f, g, o
#   rows 32:48  cols 0:64  W_hh^T
#   rows 48:64  cols 0:16  fc2[:, :16]^T    (embedding half folded into bias)
#   rows 64:80  cols 0:16  fc21^T
#   rows 80:96  cols 0:2   fc3^T
#
# Packed bias slab (8, 128) f32:
#   row 0 lanes 0:16  fc1 bias
#   row 1 lanes 0:64  b_ih + b_hh
#   row 2 lanes 0:16  fc2 bias + emb @ fc2_w[:, 16:24]^T   (folded)
#   row 3 lanes 0:16  fc21 bias
#   row 4 lanes 0:2   fc3 bias
#
# State slab (1, 128) f32: lanes 0:16 = h, lanes 16:32 = c.


def _blstm_small_seq_kernel(x_ref, state_ref, w_ref, b_ref,
                            y_ref, state_out_ref, gx_ref, h_ref):
    f32 = jnp.float32
    T = x_ref.shape[0]

    # ---- batched over T: everything that does not depend on h/c ----------
    # fc1 + ReLU.  x is pre-padded to 16 lanes; slab rows 13:16 are zero, so
    # the tile-aligned 16-row weight slice gives the identical result.
    a1 = jnp.maximum(
        jnp.dot(x_ref[...], w_ref[0:16, 0:16], preferred_element_type=f32)
        + b_ref[0:1, 0:16],
        0.0,
    )                                                               # (T, 16)
    # Input half of the LSTM gate pre-activations, hoisted off the serial
    # chain: a1 @ W_ih^T + (b_ih + b_hh).
    gx_ref[...] = (
        jnp.dot(a1, w_ref[16:32, 0:64], preferred_element_type=f32)
        + b_ref[1:2, 0:64]
    )                                                               # (T, 64)

    # ---- serial recurrence: one (1,16)@(16,64) MXU push + EUP per step ----
    h0 = state_ref[0:1, 0:16]
    c0 = state_ref[0:1, 16:32]

    def step(t, carry):
        h, c = carry
        gates = (gx_ref[pl.ds(t, 1), :]
                 + jnp.dot(h, w_ref[32:48, 0:64], preferred_element_type=f32))
        sig = jax.nn.sigmoid(gates)              # i, f, o in one EUP pass
        gg = jnp.tanh(gates[:, 32:48])
        c_new = sig[:, 16:32] * c + sig[:, 0:16] * gg
        h_new = sig[:, 48:64] * jnp.tanh(c_new)
        h_ref[pl.ds(t, 1), :] = h_new            # stash for the batched head
        return h_new, c_new

    unroll = True if T <= 16 else 8
    h_fin, c_fin = jax.lax.fori_loop(0, T, step, (h0, c0), unroll=unroll)

    # ---- batched over T: fc2 -> fc21 -> fc3 -> softmax --------------------
    h_all = h_ref[...]                                              # (T, 16)
    a2 = jnp.maximum(
        jnp.dot(h_all, w_ref[48:64, 0:16], preferred_element_type=f32)
        + b_ref[2:3, 0:16],
        0.0,
    )
    a21 = jnp.maximum(
        jnp.dot(a2, w_ref[64:80, 0:16], preferred_element_type=f32)
        + b_ref[3:4, 0:16],
        0.0,
    )
    logits = (jnp.dot(a21, w_ref[80:96, 0:2], preferred_element_type=f32)
              + b_ref[4:5, 0:2])
    m = jnp.max(logits, axis=-1, keepdims=True)
    e = jnp.exp(logits - m)
    y_ref[...] = e / jnp.sum(e, axis=-1, keepdims=True)

    # Final recurrent state, packed into one lane-padded slab.
    state_out_ref[...] = jnp.zeros((1, 128), f32)
    state_out_ref[0:1, 0:16] = h_fin
    state_out_ref[0:1, 16:32] = c_fin


def init_params(key):
    """Deterministic parameter init mimicking the PyTorch module's shapes."""
    ks = jax.random.split(key, 16)
    f32 = jnp.float32

    def lin(kw, kb, out_f, in_f):
        bound = 1.0 / jnp.sqrt(jnp.asarray(in_f, f32))
        w = jax.random.uniform(kw, (out_f, in_f), f32, -bound, bound)
        b = jax.random.uniform(kb, (out_f,), f32, -bound, bound)
        return w, b

    p = {}
    p["fc1_w"], p["fc1_b"] = lin(ks[0], ks[1], 16, 13)        # Linear(13, 16)
    p["fc2_w"], p["fc2_b"] = lin(ks[2], ks[3], 16, 24)        # Linear(24, 16)
    p["fc21_w"], p["fc21_b"] = lin(ks[4], ks[5], 16, 16)      # Linear(16, 16)
    p["fc3_w"], p["fc3_b"] = lin(ks[6], ks[7], 2, 16)         # Linear(16, 2)
    # LSTMCell(16, 16): W_ih (64,16), W_hh (64,16), b_ih (64,), b_hh (64,)
    bound = 1.0 / jnp.sqrt(jnp.asarray(16.0, f32))
    p["w_ih"] = jax.random.uniform(ks[8], (64, 16), f32, -bound, bound)
    p["w_hh"] = jax.random.uniform(ks[9], (64, 16), f32, -bound, bound)
    p["b_ih"] = jax.random.uniform(ks[10], (64,), f32, -bound, bound)
    p["b_hh"] = jax.random.uniform(ks[11], (64,), f32, -bound, bound)
    # EmbeddingModule: nn.Parameter(torch.randn(1, 8))
    p["emb"] = jax.random.normal(ks[12], (1, 8), f32)
    return p


def pack_params(p):
    """One-time packing of all weights/biases into two VMEM-friendly slabs."""
    f32 = jnp.float32
    w = jnp.zeros((96, 128), f32)
    w = w.at[0:13, 0:16].set(p["fc1_w"].T)            # rows 13:16 stay zero
    w = w.at[16:32, 0:64].set(p["w_ih"].T)
    w = w.at[32:48, 0:64].set(p["w_hh"].T)
    w = w.at[48:64, 0:16].set(p["fc2_w"][:, 0:16].T)  # acts on h only
    w = w.at[64:80, 0:16].set(p["fc21_w"].T)
    w = w.at[80:96, 0:2].set(p["fc3_w"].T)

    b = jnp.zeros((8, 128), f32)
    b = b.at[0, 0:16].set(p["fc1_b"])
    b = b.at[1, 0:64].set(p["b_ih"] + p["b_hh"])
    # Fold the (constant) embedding's fc2 contribution into fc2's bias.
    b = b.at[2, 0:16].set(p["fc2_b"] + p["emb"][0] @ p["fc2_w"][:, 16:24].T)
    b = b.at[3, 0:16].set(p["fc21_b"])
    b = b.at[4, 0:2].set(p["fc3_b"])
    return w, b


def _make_state_slab(h0, c0):
    st = jnp.zeros((1, 128), jnp.float32)
    st = st.at[:, 0:16].set(h0)
    st = st.at[:, 16:32].set(c0)
    return st


@jax.jit
def blstm_small_forward_seq(x_seq, h0, c0, w_packed, b_packed):
    """Run the cell over a whole (T, 13) sequence in ONE kernel launch.

    Per-step semantics are exactly the PyTorch module's forward() applied T
    times with the hidden state carried between calls.
    Returns (y_seq (T, 2), h_T (1, 16), c_T (1, 16)).
    """
    T = x_seq.shape[0]
    x_pad = jnp.pad(x_seq.astype(jnp.float32), ((0, 0), (0, 3)))   # (T, 16)
    state0 = _make_state_slab(h0, c0)                              # (1, 128)
    vmem = pl.BlockSpec(memory_space=pltpu.MemorySpace.VMEM)

    y_seq, state_out = pl.pallas_call(
        _blstm_small_seq_kernel,
        out_shape=(
            jax.ShapeDtypeStruct((T, 2), jnp.float32),    # softmax per step
            jax.ShapeDtypeStruct((1, 128), jnp.float32),  # packed (h_T, c_T)
        ),
        in_specs=[vmem, vmem, vmem, vmem],
        out_specs=(vmem, vmem),
        scratch_shapes=[
            pltpu.VMEM((T, 64), jnp.float32),   # input-half gate preacts
            pltpu.VMEM((T, 16), jnp.float32),   # per-step hidden states
        ],
        # The state slab is produced inside this jit, so XLA can alias it to
        # the output buffer with no caller-side donation required.
        input_output_aliases={1: 1},
    )(x_pad, state0, w_packed, b_packed)

    return y_seq, state_out[:, 0:16], state_out[:, 16:32]


def blstm_small_forward(x, h0, c0, w_packed, b_packed):
    """Single-step forward (T == 1): exactly the PyTorch module's forward()."""
    return blstm_small_forward_seq(x, h0, c0, w_packed, b_packed)


def blstm_small_reference(x, h0, c0, p):
    """Pure-JAX reference of one PyTorch forward() step, for validation."""
    a1 = jnp.maximum(x @ p["fc1_w"].T + p["fc1_b"], 0.0)
    gates = a1 @ p["w_ih"].T + p["b_ih"] + h0 @ p["w_hh"].T + p["b_hh"]
    gi = jax.nn.sigmoid(gates[:, 0:16])
    gf = jax.nn.sigmoid(gates[:, 16:32])
    gg = jnp.tanh(gates[:, 32:48])
    go = jax.nn.sigmoid(gates[:, 48:64])
    c_new = gf * c0 + gi * gg
    h_new = go * jnp.tanh(c_new)
    cat = jnp.concatenate([h_new, p["emb"]], axis=1)
    a2 = jnp.maximum(cat @ p["fc2_w"].T + p["fc2_b"], 0.0)
    a21 = jnp.maximum(a2 @ p["fc21_w"].T + p["fc21_b"], 0.0)
    logits = a21 @ p["fc3_w"].T + p["fc3_b"]
    y = jax.nn.softmax(logits, axis=1)
    return y, h_new, c_new


if __name__ == "__main__":
    key = jax.random.PRNGKey(0)
    kp, kx, kh, kc = jax.random.split(key, 4)

    params = init_params(kp)
    w_packed, b_packed = pack_params(params)   # one-time packing

    # Small shapes consistent with the module: batch=1 per step, seq T=8.
    T = 8
    x_seq = jax.random.normal(kx, (T, 13), jnp.float32)
    h0 = jax.random.normal(kh, (1, 16), jnp.float32)
    c0 = jax.random.normal(kc, (1, 16), jnp.float32)

    # Sequence kernel: T steps in one launch.
    y_seq, h_T, c_T = blstm_small_forward_seq(x_seq, h0, c0, w_packed, b_packed)
    jax.block_until_ready((y_seq, h_T, c_T))

    # Single-step path (T == 1): the module's forward() verbatim.
    y1, h1, c1 = blstm_small_forward(x_seq[0:1], h0, c0, w_packed, b_packed)
    jax.block_until_ready((y1, h1, c1))

    # Pure-JAX reference, stepped T times with carried hidden state.
    ys_ref = []
    h_r, c_r = h0, c0
    for t in range(T):
        y_r, h_r, c_r = blstm_small_reference(x_seq[t:t + 1], h_r, c_r, params)
        ys_ref.append(y_r)
    y_ref_seq = jnp.concatenate(ys_ref, axis=0)

    assert jnp.allclose(y_seq, y_ref_seq, atol=1e-5, rtol=1e-4)
    assert jnp.allclose(h_T, h_r, atol=1e-5, rtol=1e-4)
    assert jnp.allclose(c_T, c_r, atol=1e-5, rtol=1e-4)

    y1_ref, h1_ref, c1_ref = blstm_small_reference(x_seq[0:1], h0, c0, params)
    assert jnp.allclose(y1, y1_ref, atol=1e-5, rtol=1e-4)
    assert jnp.allclose(h1, h1_ref, atol=1e-5, rtol=1e-4)
    assert jnp.allclose(c1, c1_ref, atol=1e-5, rtol=1e-4)

    print("KERNEL_OK")
</pallas_src>

<mosaic_0001>
module attributes {stable_mosaic.version = 11 : i64} {
  func.func @_blstm_small_seq_kernel(%arg0: memref<8x16xf32, #tpu.memory_space<vmem>>, %arg1: memref<1x128xf32, #tpu.memory_space<vmem>>, %arg2: memref<96x128xf32, #tpu.memory_space<vmem>>, %arg3: memref<8x128xf32, #tpu.memory_space<vmem>>, %arg4: memref<8x2xf32, #tpu.memory_space<vmem>>, %arg5: memref<1x128xf32, #tpu.memory_space<vmem>>, %arg6: memref<8x64xf32, #tpu.memory_space<vmem>>, %arg7: memref<8x16xf32, #tpu.memory_space<vmem>>) attributes {dimension_semantics = [], scalar_prefetch = 0 : i64, scratch_operands = 2 : i64, tpu.core_type = #tpu.core_type<tc>} {
    %c0 = arith.constant 0 : index
    %c0_0 = arith.constant 0 : index
    %0 = vector.load %arg0[%c0, %c0_0] : memref<8x16xf32, #tpu.memory_space<vmem>>, vector<8x16xf32>
    %c0_1 = arith.constant 0 : index
    %c0_2 = arith.constant 0 : index
    %1 = vector.load %arg2[%c0_1, %c0_2] : memref<96x128xf32, #tpu.memory_space<vmem>>, vector<16x16xf32>
    %cst = arith.constant dense<0.000000e+00> : vector<8x16xf32>
    %2 = tpu.matmul %0, %1, %cst {dimension_numbers = #tpu.dot_dimension_numbers<[1], [0], [0], [1], [0, 0, 1, 1], [], []>} : vector<8x16xf32>, vector<16x16xf32>, vector<8x16xf32> -> vector<8x16xf32>
    %c0_3 = arith.constant 0 : index
    %c0_4 = arith.constant 0 : index
    %3 = vector.load %arg3[%c0_3, %c0_4] : memref<8x128xf32, #tpu.memory_space<vmem>>, vector<1x16xf32>
    %4 = vector.broadcast %3 : vector<1x16xf32> to vector<8x16xf32>
    %5 = arith.addf %2, %4 : vector<8x16xf32>
    %cst_5 = arith.constant 0.000000e+00 : f32
    %6 = vector.broadcast %cst_5 : f32 to vector<8x16xf32>
    %7 = arith.maximumf %5, %6 : vector<8x16xf32>
    %c16 = arith.constant 16 : index
    %c0_6 = arith.constant 0 : index
    %8 = vector.load %arg2[%c16, %c0_6] : memref<96x128xf32, #tpu.memory_space<vmem>>, vector<16x64xf32>
    %cst_7 = arith.constant dense<0.000000e+00> : vector<8x64xf32>
    %9 = tpu.matmul %7, %8, %cst_7 {dimension_numbers = #tpu.dot_dimension_numbers<[1], [0], [0], [1], [0, 0, 1, 1], [], []>} : vector<8x16xf32>, vector<16x64xf32>, vector<8x64xf32> -> vector<8x64xf32>
    %c1 = arith.constant 1 : index
    %c0_8 = arith.constant 0 : index
    %10 = vector.load %arg3[%c1, %c0_8] : memref<8x128xf32, #tpu.memory_space<vmem>>, vector<1x64xf32>
    %11 = vector.broadcast %10 : vector<1x64xf32> to vector<8x64xf32>
    %12 = arith.addf %9, %11 : vector<8x64xf32>
    %c0_9 = arith.constant 0 : index
    %c0_10 = arith.constant 0 : index
    %13 = vector.load %arg6[%c0_9, %c0_10] : memref<8x64xf32, #tpu.memory_space<vmem>>, vector<8x64xf32>
    tpu.vector_store %arg6[%c0_9, %c0_10], %12 {strides = array<i32>} : memref<8x64xf32, #tpu.memory_space<vmem>>, vector<8x64xf32>,
    %c0_11 = arith.constant 0 : index
    %c0_12 = arith.constant 0 : index
    %14 = vector.load %arg1[%c0_11, %c0_12] : memref<1x128xf32, #tpu.memory_space<vmem>>, vector<1x16xf32>
    %c0_13 = arith.constant 0 : index
    %c16_14 = arith.constant 16 : index
    %15 = vector.load %arg1[%c0_13, %c16_14] : memref<1x128xf32, #tpu.memory_space<vmem>>, vector<1x16xf32>
    %c0_i32 = arith.constant 0 : i32
    %16 = arith.index_cast %c0_i32 : i32 to index
    %c0_15 = arith.constant 0 : index
    %17 = vector.load %arg6[%16, %c0_15] : memref<8x64xf32, #tpu.memory_space<vmem>>, vector<1x64xf32>
    %c32 = arith.constant 32 : index
    %c0_16 = arith.constant 0 : index
    %18 = vector.load %arg2[%c32, %c0_16] : memref<96x128xf32, #tpu.memory_space<vmem>>, vector<16x64xf32>
    %cst_17 = arith.constant dense<0.000000e+00> : vector<1x64xf32>
    %19 = tpu.matmul %14, %18, %cst_17 {dimension_numbers = #tpu.dot_dimension_numbers<[1], [0], [0], [1], [0, 0, 1, 1], [], []>} : vector<1x16xf32>, vector<16x64xf32>, vector<1x64xf32> -> vector<1x64xf32>
    %20 = arith.addf %17, %19 : vector<1x64xf32>
    %21 = arith.negf %20 : vector<1x64xf32>
    %22 = math.exp %21 : vector<1x64xf32>
    %cst_18 = arith.constant 1.000000e+00 : f32
    %23 = vector.broadcast %cst_18 : f32 to vector<1x64xf32>
    %24 = arith.addf %23, %22 : vector<1x64xf32>
    %25 = arith.divf %23, %24 : vector<1x64xf32>
    %26 = vector.extract_strided_slice %20 {offsets = [0, 32], sizes = [1, 16], strides = [1, 1]} : vector<1x64xf32> to vector<1x16xf32>
    %27 = math.tanh %26 : vector<1x16xf32>
    %28 = vector.extract_strided_slice %25 {offsets = [0, 16], sizes = [1, 16], strides = [1, 1]} : vector<1x64xf32> to vector<1x16xf32>
    %29 = arith.mulf %28, %15 : vector<1x16xf32>
    %30 = vector.extract_strided_slice %25 {offsets = [0, 0], sizes = [1, 16], strides = [1, 1]} : vector<1x64xf32> to vector<1x16xf32>
    %31 = arith.mulf %30, %27 : vector<1x16xf32>
    %32 = arith.addf %29, %31 : vector<1x16xf32>
    %33 = vector.extract_strided_slice %25 {offsets = [0, 48], sizes = [1, 16], strides = [1, 1]} : vector<1x64xf32> to vector<1x16xf32>
    %34 = math.tanh %32 : vector<1x16xf32>
    %35 = arith.mulf %33, %34 : vector<1x16xf32>
    %36 = arith.index_cast %c0_i32 : i32 to index
    %c0_19 = arith.constant 0 : index
    %37 = vector.load %arg7[%36, %c0_19] : memref<8x16xf32, #tpu.memory_space<vmem>>, vector<1x16xf32>
    tpu.vector_store %arg7[%36, %c0_19], %35 {strides = array<i32>} : memref<8x16xf32, #tpu.memory_space<vmem>>, vector<1x16xf32>,
    %c1_i32 = arith.constant 1 : i32
    %38 = arith.index_cast %c1_i32 : i32 to index
    %c0_20 = arith.constant 0 : index
    %39 = vector.load %arg6[%38, %c0_20] : memref<8x64xf32, #tpu.memory_space<vmem>>, vector<1x64xf32>
    %c32_21 = arith.constant 32 : index
    %c0_22 = arith.constant 0 : index
    %40 = vector.load %arg2[%c32_21, %c0_22] : memref<96x128xf32, #tpu.memory_space<vmem>>, vector<16x64xf32>
    %cst_23 = arith.constant dense<0.000000e+00> : vector<1x64xf32>
    %41 = tpu.matmul %35, %40, %cst_23 {dimension_numbers = #tpu.dot_dimension_numbers<[1], [0], [0], [1], [0, 0, 1, 1], [], []>} : vector<1x16xf32>, vector<16x64xf32>, vector<1x64xf32> -> vector<1x64xf32>
    %42 = arith.addf %39, %41 : vector<1x64xf32>
    %43 = arith.negf %42 : vector<1x64xf32>
    %44 = math.exp %43 : vector<1x64xf32>
    %cst_24 = arith.constant 1.000000e+00 : f32
    %45 = vector.broadcast %cst_24 : f32 to vector<1x64xf32>
    %46 = arith.addf %45, %44 : vector<1x64xf32>
    %47 = arith.divf %45, %46 : vector<1x64xf32>
    %48 = vector.extract_strided_slice %42 {offsets = [0, 32], sizes = [1, 16], strides = [1, 1]} : vector<1x64xf32> to vector<1x16xf32>
    %49 = math.tanh %48 : vector<1x16xf32>
    %50 = vector.extract_strided_slice %47 {offsets = [0, 16], sizes = [1, 16], strides = [1, 1]} : vector<1x64xf32> to vector<1x16xf32>
    %51 = arith.mulf %50, %32 : vector<1x16xf32>
    %52 = vector.extract_strided_slice %47 {offsets = [0, 0], sizes = [1, 16], strides = [1, 1]} : vector<1x64xf32> to vector<1x16xf32>
    %53 = arith.mulf %52, %49 : vector<1x16xf32>
    %54 = arith.addf %51, %53 : vector<1x16xf32>
    %55 = vector.extract_strided_slice %47 {offsets = [0, 48], sizes = [1, 16], strides = [1, 1]} : vector<1x64xf32> to vector<1x16xf32>
    %56 = math.tanh %54 : vector<1x16xf32>
    %57 = arith.mulf %55, %56 : vector<1x16xf32>
    %58 = arith.index_cast %c1_i32 : i32 to index
    %c0_25 = arith.constant 0 : index
    %59 = vector.load %arg7[%58, %c0_25] : memref<8x16xf32, #tpu.memory_space<vmem>>, vector<1x16xf32>
    tpu.vector_store %arg7[%58, %c0_25], %57 {strides = array<i32>} : memref<8x16xf32, #tpu.memory_space<vmem>>, vector<1x16xf32>,
    %c2_i32 = arith.constant 2 : i32
    %60 = arith.index_cast %c2_i32 : i32 to index
    %c0_26 = arith.constant 0 : index
    %61 = vector.load %arg6[%60, %c0_26] : memref<8x64xf32, #tpu.memory_space<vmem>>, vector<1x64xf32>
    %c32_27 = arith.constant 32 : index
    %c0_28 = arith.constant 0 : index
    %62 = vector.load %arg2[%c32_27, %c0_28] : memref<96x128xf32, #tpu.memory_space<vmem>>, vector<16x64xf32>
    %cst_29 = arith.constant dense<0.000000e+00> : vector<1x64xf32>
    %63 = tpu.matmul %57, %62, %cst_29 {dimension_numbers = #tpu.dot_dimension_numbers<[1], [0], [0], [1], [0, 0, 1, 1], [], []>} : vector<1x16xf32>, vector<16x64xf32>, vector<1x64xf32> -> vector<1x64xf32>
    %64 = arith.addf %61, %63 : vector<1x64xf32>
    %65 = arith.negf %64 : vector<1x64xf32>
    %66 = math.exp %65 : vector<1x64xf32>
    %cst_30 = arith.constant 1.000000e+00 : f32
    %67 = vector.broadcast %cst_30 : f32 to vector<1x64xf32>
    %68 = arith.addf %67, %66 : vector<1x64xf32>
    %69 = arith.divf %67, %68 : vector<1x64xf32>
    %70 = vector.extract_strided_slice %64 {offsets = [0, 32], sizes = [1, 16], strides = [1, 1]} : vector<1x64xf32> to vector<1x16xf32>
    %71 = math.tanh %70 : vector<1x16xf32>
    %72 = vector.extract_strided_slice %69 {offsets = [0, 16], sizes = [1, 16], strides = [1, 1]} : vector<1x64xf32> to vector<1x16xf32>
    %73 = arith.mulf %72, %54 : vector<1x16xf32>
    %74 = vector.extract_strided_slice %69 {offsets = [0, 0], sizes = [1, 16], strides = [1, 1]} : vector<1x64xf32> to vector<1x16xf32>
    %75 = arith.mulf %74, %71 : vector<1x16xf32>
    %76 = arith.addf %73, %75 : vector<1x16xf32>
    %77 = vector.extract_strided_slice %69 {offsets = [0, 48], sizes = [1, 16], strides = [1, 1]} : vector<1x64xf32> to vector<1x16xf32>
    %78 = math.tanh %76 : vector<1x16xf32>
    %79 = arith.mulf %77, %78 : vector<1x16xf32>
    %80 = arith.index_cast %c2_i32 : i32 to index
    %c0_31 = arith.constant 0 : index
    %81 = vector.load %arg7[%80, %c0_31] : memref<8x16xf32, #tpu.memory_space<vmem>>, vector<1x16xf32>
    tpu.vector_store %arg7[%80, %c0_31], %79 {strides = array<i32>} : memref<8x16xf32, #tpu.memory_space<vmem>>, vector<1x16xf32>,
    %c3_i32 = arith.constant 3 : i32
    %82 = arith.index_cast %c3_i32 : i32 to index
    %c0_32 = arith.constant 0 : index
    %83 = vector.load %arg6[%82, %c0_32] : memref<8x64xf32, #tpu.memory_space<vmem>>, vector<1x64xf32>
    %c32_33 = arith.constant 32 : index
    %c0_34 = arith.constant 0 : index
    %84 = vector.load %arg2[%c32_33, %c0_34] : memref<96x128xf32, #tpu.memory_space<vmem>>, vector<16x64xf32>
    %cst_35 = arith.constant dense<0.000000e+00> : vector<1x64xf32>
    %85 = tpu.matmul %79, %84, %cst_35 {dimension_numbers = #tpu.dot_dimension_numbers<[1], [0], [0], [1], [0, 0, 1, 1], [], []>} : vector<1x16xf32>, vector<16x64xf32>, vector<1x64xf32> -> vector<1x64xf32>
    %86 = arith.addf %83, %85 : vector<1x64xf32>
    %87 = arith.negf %86 : vector<1x64xf32>
    %88 = math.exp %87 : vector<1x64xf32>
    %cst_36 = arith.constant 1.000000e+00 : f32
    %89 = vector.broadcast %cst_36 : f32 to vector<1x64xf32>
    %90 = arith.addf %89, %88 : vector<1x64xf32>
    %91 = arith.divf %89, %90 : vector<1x64xf32>
    %92 = vector.extract_strided_slice %86 {offsets = [0, 32], sizes = [1, 16], strides = [1, 1]} : vector<1x64xf32> to vector<1x16xf32>
    %93 = math.tanh %92 : vector<1x16xf32>
    %94 = vector.extract_strided_slice %91 {offsets = [0, 16], sizes = [1, 16], strides = [1, 1]} : vector<1x64xf32> to vector<1x16xf32>
    %95 = arith.mulf %94, %76 : vector<1x16xf32>
    %96 = vector.extract_strided_slice %91 {offsets = [0, 0], sizes = [1, 16], strides = [1, 1]} : vector<1x64xf32> to vector<1x16xf32>
    %97 = arith.mulf %96, %93 : vector<1x16xf32>
    %98 = arith.addf %95, %97 : vector<1x16xf32>
    %99 = vector.extract_strided_slice %91 {offsets = [0, 48], sizes = [1, 16], strides = [1, 1]} : vector<1x64xf32> to vector<1x16xf32>
    %100 = math.tanh %98 : vector<1x16xf32>
    %101 = arith.mulf %99, %100 : vector<1x16xf32>
    %102 = arith.index_cast %c3_i32 : i32 to index
    %c0_37 = arith.constant 0 : index
    %103 = vector.load %arg7[%102, %c0_37] : memref<8x16xf32, #tpu.memory_space<vmem>>, vector<1x16xf32>
    tpu.vector_store %arg7[%102, %c0_37], %101 {strides = array<i32>} : memref<8x16xf32, #tpu.memory_space<vmem>>, vector<1x16xf32>,
    %c4_i32 = arith.constant 4 : i32
    %104 = arith.index_cast %c4_i32 : i32 to index
    %c0_38 = arith.constant 0 : index
    %105 = vector.load %arg6[%104, %c0_38] : memref<8x64xf32, #tpu.memory_space<vmem>>, vector<1x64xf32>
    %c32_39 = arith.constant 32 : index
    %c0_40 = arith.constant 0 : index
    %106 = vector.load %arg2[%c32_39, %c0_40] : memref<96x128xf32, #tpu.memory_space<vmem>>, vector<16x64xf32>
    %cst_41 = arith.constant dense<0.000000e+00> : vector<1x64xf32>
    %107 = tpu.matmul %101, %106, %cst_41 {dimension_numbers = #tpu.dot_dimension_numbers<[1], [0], [0], [1], [0, 0, 1, 1], [], []>} : vector<1x16xf32>, vector<16x64xf32>, vector<1x64xf32> -> vector<1x64xf32>
    %108 = arith.addf %105, %107 : vector<1x64xf32>
    %109 = arith.negf %108 : vector<1x64xf32>
    %110 = math.exp %109 : vector<1x64xf32>
    %cst_42 = arith.constant 1.000000e+00 : f32
    %111 = vector.broadcast %cst_42 : f32 to vector<1x64xf32>
    %112 = arith.addf %111, %110 : vector<1x64xf32>
    %113 = arith.divf %111, %112 : vector<1x64xf32>
    %114 = vector.extract_strided_slice %108 {offsets = [0, 32], sizes = [1, 16], strides = [1, 1]} : vector<1x64xf32> to vector<1x16xf32>
    %115 = math.tanh %114 : vector<1x16xf32>
    %116 = vector.extract_strided_slice %113 {offsets = [0, 16], sizes = [1, 16], strides = [1, 1]} : vector<1x64xf32> to vector<1x16xf32>
    %117 = arith.mulf %116, %98 : vector<1x16xf32>
    %118 = vector.extract_strided_slice %113 {offsets = [0, 0], sizes = [1, 16], strides = [1, 1]} : vector<1x64xf32> to vector<1x16xf32>
    %119 = arith.mulf %118, %115 : vector<1x16xf32>
    %120 = arith.addf %117, %119 : vector<1x16xf32>
    %121 = vector.extract_strided_slice %113 {offsets = [0, 48], sizes = [1, 16], strides = [1, 1]} : vector<1x64xf32> to vector<1x16xf32>
    %122 = math.tanh %120 : vector<1x16xf32>
    %123 = arith.mulf %121, %122 : vector<1x16xf32>
    %124 = arith.index_cast %c4_i32 : i32 to index
    %c0_43 = arith.constant 0 : index
    %125 = vector.load %arg7[%124, %c0_43] : memref<8x16xf32, #tpu.memory_space<vmem>>, vector<1x16xf32>
    tpu.vector_store %arg7[%124, %c0_43], %123 {strides = array<i32>} : memref<8x16xf32, #tpu.memory_space<vmem>>, vector<1x16xf32>,
    %c5_i32 = arith.constant 5 : i32
    %126 = arith.index_cast %c5_i32 : i32 to index
    %c0_44 = arith.constant 0 : index
    %127 = vector.load %arg6[%126, %c0_44] : memref<8x64xf32, #tpu.memory_space<vmem>>, vector<1x64xf32>
    %c32_45 = arith.constant 32 : index
    %c0_46 = arith.constant 0 : index
    %128 = vector.load %arg2[%c32_45, %c0_46] : memref<96x128xf32, #tpu.memory_space<vmem>>, vector<16x64xf32>
    %cst_47 = arith.constant dense<0.000000e+00> : vector<1x64xf32>
    %129 = tpu.matmul %123, %128, %cst_47 {dimension_numbers = #tpu.dot_dimension_numbers<[1], [0], [0], [1], [0, 0, 1, 1], [], []>} : vector<1x16xf32>, vector<16x64xf32>, vector<1x64xf32> -> vector<1x64xf32>
    %130 = arith.addf %127, %129 : vector<1x64xf32>
    %131 = arith.negf %130 : vector<1x64xf32>
    %132 = math.exp %131 : vector<1x64xf32>
    %cst_48 = arith.constant 1.000000e+00 : f32
    %133 = vector.broadcast %cst_48 : f32 to vector<1x64xf32>
    %134 = arith.addf %133, %132 : vector<1x64xf32>
    %135 = arith.divf %133, %134 : vector<1x64xf32>
    %136 = vector.extract_strided_slice %130 {offsets = [0, 32], sizes = [1, 16], strides = [1, 1]} : vector<1x64xf32> to vector<1x16xf32>
    %137 = math.tanh %136 : vector<1x16xf32>
    %138 = vector.extract_strided_slice %135 {offsets = [0, 16], sizes = [1, 16], strides = [1, 1]} : vector<1x64xf32> to vector<1x16xf32>
    %139 = arith.mulf %138, %120 : vector<1x16xf32>
    %140 = vector.extract_strided_slice %135 {offsets = [0, 0], sizes = [1, 16], strides = [1, 1]} : vector<1x64xf32> to vector<1x16xf32>
    %141 = arith.mulf %140, %137 : vector<1x16xf32>
    %142 = arith.addf %139, %141 : vector<1x16xf32>
    %143 = vector.extract_strided_slice %135 {offsets = [0, 48], sizes = [1, 16], strides = [1, 1]} : vector<1x64xf32> to vector<1x16xf32>
    %144 = math.tanh %142 : vector<1x16xf32>
    %145 = arith.mulf %143, %144 : vector<1x16xf32>
    %146 = arith.index_cast %c5_i32 : i32 to index
    %c0_49 = arith.constant 0 : index
    %147 = vector.load %arg7[%146, %c0_49] : memref<8x16xf32, #tpu.memory_space<vmem>>, vector<1x16xf32>
    tpu.vector_store %arg7[%146, %c0_49], %145 {strides = array<i32>} : memref<8x16xf32, #tpu.memory_space<vmem>>, vector<1x16xf32>,
    %c6_i32 = arith.constant 6 : i32
    %148 = arith.index_cast %c6_i32 : i32 to index
    %c0_50 = arith.constant 0 : index
    %149 = vector.load %arg6[%148, %c0_50] : memref<8x64xf32, #tpu.memory_space<vmem>>, vector<1x64xf32>
    %c32_51 = arith.constant 32 : index
    %c0_52 = arith.constant 0 : index
    %150 = vector.load %arg2[%c32_51, %c0_52] : memref<96x128xf32, #tpu.memory_space<vmem>>, vector<16x64xf32>
    %cst_53 = arith.constant dense<0.000000e+00> : vector<1x64xf32>
    %151 = tpu.matmul %145, %150, %cst_53 {dimension_numbers = #tpu.dot_dimension_numbers<[1], [0], [0], [1], [0, 0, 1, 1], [], []>} : vector<1x16xf32>, vector<16x64xf32>, vector<1x64xf32> -> vector<1x64xf32>
    %152 = arith.addf %149, %151 : vector<1x64xf32>
    %153 = arith.negf %152 : vector<1x64xf32>
    %154 = math.exp %153 : vector<1x64xf32>
    %cst_54 = arith.constant 1.000000e+00 : f32
    %155 = vector.broadcast %cst_54 : f32 to vector<1x64xf32>
    %156 = arith.addf %155, %154 : vector<1x64xf32>
    %157 = arith.divf %155, %156 : vector<1x64xf32>
    %158 = vector.extract_strided_slice %152 {offsets = [0, 32], sizes = [1, 16], strides = [1, 1]} : vector<1x64xf32> to vector<1x16xf32>
    %159 = math.tanh %158 : vector<1x16xf32>
    %160 = vector.extract_strided_slice %157 {offsets = [0, 16], sizes = [1, 16], strides = [1, 1]} : vector<1x64xf32> to vector<1x16xf32>
    %161 = arith.mulf %160, %142 : vector<1x16xf32>
    %162 = vector.extract_strided_slice %157 {offsets = [0, 0], sizes = [1, 16], strides = [1, 1]} : vector<1x64xf32> to vector<1x16xf32>
    %163 = arith.mulf %162, %159 : vector<1x16xf32>
    %164 = arith.addf %161, %163 : vector<1x16xf32>
    %165 = vector.extract_strided_slice %157 {offsets = [0, 48], sizes = [1, 16], strides = [1, 1]} : vector<1x64xf32> to vector<1x16xf32>
    %166 = math.tanh %164 : vector<1x16xf32>
    %167 = arith.mulf %165, %166 : vector<1x16xf32>
    %168 = arith.index_cast %c6_i32 : i32 to index
    %c0_55 = arith.constant 0 : index
    %169 = vector.load %arg7[%168, %c0_55] : memref<8x16xf32, #tpu.memory_space<vmem>>, vector<1x16xf32>
    tpu.vector_store %arg7[%168, %c0_55], %167 {strides = array<i32>} : memref<8x16xf32, #tpu.memory_space<vmem>>, vector<1x16xf32>,
    %c7_i32 = arith.constant 7 : i32
    %170 = arith.index_cast %c7_i32 : i32 to index
    %c0_56 = arith.constant 0 : index
    %171 = vector.load %arg6[%170, %c0_56] : memref<8x64xf32, #tpu.memory_space<vmem>>, vector<1x64xf32>
    %c32_57 = arith.constant 32 : index
    %c0_58 = arith.constant 0 : index
    %172 = vector.load %arg2[%c32_57, %c0_58] : memref<96x128xf32, #tpu.memory_space<vmem>>, vector<16x64xf32>
    %cst_59 = arith.constant dense<0.000000e+00> : vector<1x64xf32>
    %173 = tpu.matmul %167, %172, %cst_59 {dimension_numbers = #tpu.dot_dimension_numbers<[1], [0], [0], [1], [0, 0, 1, 1], [], []>} : vector<1x16xf32>, vector<16x64xf32>, vector<1x64xf32> -> vector<1x64xf32>
    %174 = arith.addf %171, %173 : vector<1x64xf32>
    %175 = arith.negf %174 : vector<1x64xf32>
    %176 = math.exp %175 : vector<1x64xf32>
    %cst_60 = arith.constant 1.000000e+00 : f32
    %177 = vector.broadcast %cst_60 : f32 to vector<1x64xf32>
    %178 = arith.addf %177, %176 : vector<1x64xf32>
    %179 = arith.divf %177, %178 : vector<1x64xf32>
    %180 = vector.extract_strided_slice %174 {offsets = [0, 32], sizes = [1, 16], strides = [1, 1]} : vector<1x64xf32> to vector<1x16xf32>
    %181 = math.tanh %180 : vector<1x16xf32>
    %182 = vector.extract_strided_slice %179 {offsets = [0, 16], sizes = [1, 16], strides = [1, 1]} : vector<1x64xf32> to vector<1x16xf32>
    %183 = arith.mulf %182, %164 : vector<1x16xf32>
    %184 = vector.extract_strided_slice %179 {offsets = [0, 0], sizes = [1, 16], strides = [1, 1]} : vector<1x64xf32> to vector<1x16xf32>
    %185 = arith.mulf %184, %181 : vector<1x16xf32>
    %186 = arith.addf %183, %185 : vector<1x16xf32>
    %187 = vector.extract_strided_slice %179 {offsets = [0, 48], sizes = [1, 16], strides = [1, 1]} : vector<1x64xf32> to vector<1x16xf32>
    %188 = math.tanh %186 : vector<1x16xf32>
    %189 = arith.mulf %187, %188 : vector<1x16xf32>
    %190 = arith.index_cast %c7_i32 : i32 to index
    %c0_61 = arith.constant 0 : index
    %191 = vector.load %arg7[%190, %c0_61] : memref<8x16xf32, #tpu.memory_space<vmem>>, vector<1x16xf32>
    tpu.vector_store %arg7[%190, %c0_61], %189 {strides = array<i32>} : memref<8x16xf32, #tpu.memory_space<vmem>>, vector<1x16xf32>,
    %c8_i32 = arith.constant 8 : i32
    %c0_62 = arith.constant 0 : index
    %c0_63 = arith.constant 0 : index
    %192 = vector.load %arg7[%c0_62, %c0_63] : memref<8x16xf32, #tpu.memory_space<vmem>>, vector<8x16xf32>
    %c48 = arith.constant 48 : index
    %c0_64 = arith.constant 0 : index
    %193 = vector.load %arg2[%c48, %c0_64] : memref<96x128xf32, #tpu.memory_space<vmem>>, vector<16x16xf32>
    %cst_65 = arith.constant dense<0.000000e+00> : vector<8x16xf32>
    %194 = tpu.matmul %192, %193, %cst_65 {dimension_numbers = #tpu.dot_dimension_numbers<[1], [0], [0], [1], [0, 0, 1, 1], [], []>} : vector<8x16xf32>, vector<16x16xf32>, vector<8x16xf32> -> vector<8x16xf32>
    %c2 = arith.constant 2 : index
    %c0_66 = arith.constant 0 : index
    %195 = vector.load %arg3[%c2, %c0_66] : memref<8x128xf32, #tpu.memory_space<vmem>>, vector<1x16xf32>
    %196 = vector.broadcast %195 : vector<1x16xf32> to vector<8x16xf32>
    %197 = arith.addf %194, %196 : vector<8x16xf32>
    %cst_67 = arith.constant 0.000000e+00 : f32
    %198 = vector.broadcast %cst_67 : f32 to vector<8x16xf32>
    %199 = arith.maximumf %197, %198 : vector<8x16xf32>
    %c64 = arith.constant 64 : index
    %c0_68 = arith.constant 0 : index
    %200 = vector.load %arg2[%c64, %c0_68] : memref<96x128xf32, #tpu.memory_space<vmem>>, vector<16x16xf32>
    %cst_69 = arith.constant dense<0.000000e+00> : vector<8x16xf32>
    %201 = tpu.matmul %199, %200, %cst_69 {dimension_numbers = #tpu.dot_dimension_numbers<[1], [0], [0], [1], [0, 0, 1, 1], [], []>} : vector<8x16xf32>, vector<16x16xf32>, vector<8x16xf32> -> vector<8x16xf32>
    %c3 = arith.constant 3 : index
    %c0_70 = arith.constant 0 : index
    %202 = vector.load %arg3[%c3, %c0_70] : memref<8x128xf32, #tpu.memory_space<vmem>>, vector<1x16xf32>
    %203 = vector.broadcast %202 : vector<1x16xf32> to vector<8x16xf32>
    %204 = arith.addf %201, %203 : vector<8x16xf32>
    %cst_71 = arith.constant 0.000000e+00 : f32
    %205 = vector.broadcast %cst_71 : f32 to vector<8x16xf32>
    %206 = arith.maximumf %204, %205 : vector<8x16xf32>
    %c80 = arith.constant 80 : index
    %c0_72 = arith.constant 0 : index
    %207 = vector.load %arg2[%c80, %c0_72] : memref<96x128xf32, #tpu.memory_space<vmem>>, vector<16x2xf32>
    %cst_73 = arith.constant dense<0.000000e+00> : vector<8x2xf32>
    %208 = tpu.matmul %206, %207, %cst_73 {dimension_numbers = #tpu.dot_dimension_numbers<[1], [0], [0], [1], [0, 0, 1, 1], [], []>} : vector<8x16xf32>, vector<16x2xf32>, vector<8x2xf32> -> vector<8x2xf32>
    %c4 = arith.constant 4 : index
    %c0_74 = arith.constant 0 : index
    %209 = vector.load %arg3[%c4, %c0_74] : memref<8x128xf32, #tpu.memory_space<vmem>>, vector<1x2xf32>
    %210 = vector.broadcast %209 : vector<1x2xf32> to vector<8x2xf32>
    %211 = arith.addf %208, %210 : vector<8x2xf32>
    %cst_75 = arith.constant dense<0xFF800000> : vector<8xf32>
    %212 = vector.multi_reduction <maximumf>, %211, %cst_75 [1] : vector<8x2xf32> to vector<8xf32>
    %213 = vector.shape_cast %212 : vector<8xf32> to vector<8x1xf32>
    %214 = vector.broadcast %213 : vector<8x1xf32> to vector<8x2xf32>
    %215 = arith.subf %211, %214 : vector<8x2xf32>
    %216 = math.exp %215 : vector<8x2xf32>
    %cst_76 = arith.constant dense<0.000000e+00> : vector<8xf32>
    %217 = vector.multi_reduction <add>, %216, %cst_76 [1] : vector<8x2xf32> to vector<8xf32>
    %218 = vector.shape_cast %217 : vector<8xf32> to vector<8x1xf32>
    %219 = vector.broadcast %218 : vector<8x1xf32> to vector<8x2xf32>
    %220 = arith.divf %216, %219 : vector<8x2xf32>
    %c0_77 = arith.constant 0 : index
    %c0_78 = arith.constant 0 : index
    %221 = vector.load %arg4[%c0_77, %c0_78] : memref<8x2xf32, #tpu.memory_space<vmem>>, vector<8x2xf32>
    tpu.vector_store %arg4[%c0_77, %c0_78], %220 {strides = array<i32>} : memref<8x2xf32, #tpu.memory_space<vmem>>, vector<8x2xf32>,
    %cst_79 = arith.constant 0.000000e+00 : f32
    %222 = vector.broadcast %cst_79 : f32 to vector<1x128xf32>
    %c0_80 = arith.constant 0 : index
    %c0_81 = arith.constant 0 : index
    %223 = vector.load %arg5[%c0_80, %c0_81] : memref<1x128xf32, #tpu.memory_space<vmem>>, vector<1x128xf32>
    tpu.vector_store %arg5[%c0_80, %c0_81], %222 {strides = array<i32>} : memref<1x128xf32, #tpu.memory_space<vmem>>, vector<1x128xf32>,
    %c0_82 = arith.constant 0 : index
    %c0_83 = arith.constant 0 : index
    %224 = vector.load %arg5[%c0_82, %c0_83] : memref<1x128xf32, #tpu.memory_space<vmem>>, vector<1x16xf32>
    tpu.vector_store %arg5[%c0_82, %c0_83], %189 {strides = array<i32>} : memref<1x128xf32, #tpu.memory_space<vmem>>, vector<1x16xf32>,
    %c0_84 = arith.constant 0 : index
    %c16_85 = arith.constant 16 : index
    %225 = vector.load %arg5[%c0_84, %c16_85] : memref<1x128xf32, #tpu.memory_space<vmem>>, vector<1x16xf32>
    tpu.vector_store %arg5[%c0_84, %c16_85], %186 {strides = array<i32>} : memref<1x128xf32, #tpu.memory_space<vmem>>, vector<1x16xf32>,
    return
  }
}

</mosaic_0001>

<bundles_post_ra>
// kernel: blstm_small_forward_seq.1
= control target key start
LH: loop header
LB: loop body
LE: loop exit
PB: predicated region body
PF: predicated region fallthrough
CT: control target
= control target key end

     0   :  { %11 = vsyncpa [#allocation5], 0  ;;  %s1607_s18 = smov [#allocation4]   ;;  %s1799_s0 = inlined_call_operand.vmem [shape: f32[8,16], index: 0, kind: input, shape index: {}]   ;;  %s1800_s1 = inlined_call_operand.vmem [shape: f32[1,128], index: 1, kind: input, shape index: {}, may-alias: {1,5}]   ;;  %s1801_s2 = inlined_call_operand.hbm [shape: f32[96,128], index: 2, kind: input, shape index: {}]   ;;  %s1802_s3 = inlined_call_operand.vmem [shape: f32[8,128], index: 3, kind: input, shape index: {}]   ;;  %s1803_s4 = inlined_call_operand.vmem [shape: f32[8,2], index: 4, kind: output, shape index: {0}]   ;;  %s1804_s5 = inlined_call_operand.vmem [shape: f32[1,128], index: 5, kind: output, shape index: {1}, may-alias: {1,5}]  }
   0x1   :  { %s21_s19 = sshll.u32 %s1607_s18, 4  ;;  %s1583_s22 = scalar_lea.hbm %s1801_s2, 1536  ;;  %s22_s19 = int_to_ptr.vmem [resolvable:$true] %s21_s19 }
   0x2   :  { %p1584_p0 = scmp.ne.s32.totalorder %s1801_s2, %s1583_s22  ;;  %p1587_p1 = scmp.lt.u32.totalorder %s1583_s22, %s1801_s2 }
   0x4   :  { %p1589_p2 = pnand %p1587_p1, %p1584_p0 }
   0x6   :  { %1592 = shalt.err (!%p1589_p2)
}
   0x7   :  { %s1593_s27 = scalar_lea.vmem %s22_s19, 1536  ;;  %p1598_p4 = scmp.lt.s32.totalorder %s22_s19, %s22_s19 }
   0x8   :  { %p1594_p3 = scmp.ne.s32.totalorder %s22_s19, %s1593_s27  ;;  %p1599_p5 = scmp.lt.s32.totalorder %s1593_s27, %s1593_s27 }
   0xa   :  { %p1600_p6 = por %p1599_p5, %p1598_p4 }
   0xc   :  { %p1601_p7 = pnand %p1600_p6, %p1594_p3 }
   0xe   :  { %1604 = shalt.err (!%p1601_p7)
}
   0xf   :  { %s1608_s28 = smov 128   ;;  %s1609_s29 = smov 8  }
  0x10   :  { %27 = dma.hbm_to_vmem [thread:$0]  %s1801_s2, 1536, %s22_s19, [#allocation5], %s1608_s28, %s1608_s28, %s1609_s29  }
  0x11   :  { %1605 = dma.done.wait [#allocation5], 1536  }
  0x12   :  { %1606 = vsyncadd [#allocation5], 4294965760  ;;  %v1610_v0 = vmov 0.0|0.0   ;;  %vm1611_vm0 = vmmov 0   ;;  %v1612_v1 = vmov 0.0   ;;  %v34_v2 = vld [vmem:[#allocation4] sm:$0xff] }
  0x13   :  { %1466 = vmatprep.subr.bf16.mxu0 %v1610_v0  ;;  %1379 = vmatprep.mubr.msk.f32.mxu0 %vm1611_vm0, %v1612_v1  ;;  %v35_v3 = vld [vmem:[#allocation4 + $0x8] sm:$0xff]  ;;  %v33_v5 = vld [vmem:[%s1799_s0] sm:$0xff]  ;;  %vm41_vm1 = vcmask 130048   ;;  %v117_v7 = vld [vmem:[#allocation4 + $0x18] sm:$0xff]  ;;  %vm196_vm2 = vcmask 523264   ;;  %s1613_s14 = smov 96  }
  0x14   :  { %1469 = vmatprep.subr.bf16.mxu1 %v1610_v0  ;;  %1386 = vmatprep.mubr.msk.f32.mxu1 %vm1611_vm0, %v1612_v1  ;;  %v1467_v4 = vpack.c.bf16 %v35_v3, %v34_v2  ;;  %v116_v6 = vld [vmem:[#allocation4 + $0x10] sm:$0xff]  ;;  %v200_v9 = vld [vmem:[#allocation4 + $0x20] sm:$0xff]  ;;  %v201_v10 = vld [vmem:[#allocation4 + $0x28] sm:$0xff]  ;;  %s1614_s15 = smov 16   ;;  %s1615_s16 = smov 32   ;;  %vm304_vm3 = vcmask 122880  }
  0x15   :  { %v1470_v8 = vpack.c.bf16 %v117_v7, %v116_v6  ;;  %v198_v11 = vld [vmem:[%s1800_s1] sm:$0x1]  ;;  %v1676_v12 = vpack.c.bf16 %v201_v10, %v200_v9  ;;  %v1312_v20 = vld [vmem:[%s1802_s3 + $0x1] ss:$0 sm:$0xff]  ;;  %s1616_s17 = smov 80   ;;  %vm1299_vm4 = vcmask 254080  }
  0x16   :  { %1468 = vmatpush3.bf16.msra.mxu0 %v1467_v4  ;;  %1297 = vst [vmem:[%s1804_s5] sm:$0x1] %v1612_v1  ;;  %v1310_v13 = vld [vmem:[%s1802_s3] ss:$0 sm:$0xff]  ;;  %vm1284_vm5 = vcmask 15360  }
  0x17   :  { %1472 = vmatprep.subr.bf16.mxu0 %v1610_v0  ;;  %1471 = vmatpush3.bf16.msra.mxu1 %v1470_v8 }
  0x18   :  { %1475 = vmatprep.subr.bf16.mxu1 %v1610_v0 }
  0x19   :  { %1380 = vmatmul.mubr.msk.f32.vlgmr.msra.gmra.mrb[0].mxu0 %vm41_vm1, %v33_v5 }
  0x1a   :  { %1393 = vmatprep.mubr.msk.f32.mxu0 %vm1611_vm0, %v1612_v1  ;;  %1474 = vmatpush3.bf16.msra.mxu0 %v1676_v12 }
  0x1b   :  { %1478 = vmatprep.subr.bf16.mxu0 %v1610_v0 }
  0x1d   :  { %1394 = vmatmul.mubr.msk.f32.vlgmr.msra.gmra.mrb[2].mxu0 %vm41_vm1, %v198_v11 }
  0x1e   :  { %1480 = vmatpush3.bf16.msra.mxu0 %v1676_v12  ;;  %1407 = vmatprep.mubr.msk.f32.mxu0 %vm1611_vm0, %v1612_v1 }
  0x1f   :  { %1484 = vmatprep.subr.bf16.mxu0 %v1610_v0 }
  0xec   :  { %v111_v14 = vpop.f32.mrb[0].mxu0 }
  0xed   :  { %v112_v15 = vadd.f32 %v1310_v13, %v111_v14  ;;  %v1381_v16 = vpop.f32.mrb[1].mxu0 }
  0xef   :  { %v115_v17 = vmax.f32 %v112_v15, 0.0 }
  0xf0   :  { %v271_v18 = vpop.f32.mrb[2].mxu0 }
  0xf1   :  { %1387 = vmatmul.mubr.msk.f32.vlgmr.msra.gmra.mrb[0].mxu1 %vm41_vm1, %v115_v17  ;;  %v1395_v19 = vpop.f32.mrb[3].mxu0 }
  0xf2   :  { %1477 = vmatpush3.bf16.msra.mxu1 %v1676_v12  ;;  %1400 = vmatprep.mubr.msk.f32.mxu1 %vm1611_vm0, %v1612_v1 }
  0xf3   :  { %1481 = vmatprep.subr.bf16.mxu1 %v1610_v0 }
 0x1c4   :  { %v192_v21 = vpop.f32.mrb[0].mxu1 }
 0x1c5   :  { %v193_v22 = vadd.f32 %v1312_v20, %v192_v21  ;;  %v1388_v23 = vpop.f32.mrb[1].mxu1 }
 0x1c7   :  { %197 = vst.msk [vmem:[#allocation2] sm:$0xff] %vm196_vm2, %v193_v22 }
 0x1ce   :  { %v199_v24 = vld [vmem:[#allocation2] sm:$0x1]  ;;  %v306_v40 = vld [vmem:[#allocation2 + $0x1] sm:$0x1]  ;;  %v411_v58 = vld [vmem:[#allocation2 + $0x2] sm:$0x1] }
 0x1cf   :  { %v275_v25 = vadd.f32 %v271_v18, %v199_v24  ;;  %v516_v15 = vld [vmem:[#allocation2 + $0x3] sm:$0x1] }
 0x1d1   :  { %1515 = vtanh.f32 %v275_v25  ;;  %v1315_v27 = vmul.f32 -1.442695, %v275_v25 }
 0x1d3   :  { %1517 = vpow2.f32 %v1315_v27 }
 0x1db   :  { %v1516_v26 = vpop.eup %1515 }
 0x1dc   :  { %285 = vrot.lane.b32.xlu0 %v1516_v26, %s1613_s14 }
 0x1dd   :  { %v1518_v28 = vpop.eup %1517 }
 0x1de   :  { %v279_v29 = vadd.f32 1.0, %v1518_v28 }
 0x1e0   :  { %1519 = vrcp.f32 %v279_v29 }
 0x1ea   :  { %v1520_v30 = vpop.eup %1519 }
 0x1eb   :  { %v283_v33 = vmul.f32 %v1520_v30, %v198_v11 }
 0x24e   :  { %v286_v31 = vpop.permute.xlu0 %285 }
 0x24f   :  { %v288_v32 = vmul.f32 %v1520_v30, %v286_v31 }
 0x251   :  { %290 = vrot.lane.b32.xlu0 %v288_v32, %s1614_s15 }
 0x2c3   :  { %v291_v34 = vpop.permute.xlu0 %290 }
 0x2c4   :  { %v293_v35 = vadd.f32 %v291_v34, %v283_v33  ;;  %v621_v33 = vld [vmem:[#allocation2 + $0x4] sm:$0x1] }
 0x2c6   :  { %1521 = vtanh.f32 %v293_v35 }
 0x2d0   :  { %v1522_v36 = vpop.eup %1521 }
 0x2d1   :  { %296 = vrot.lane.b32.xlu1 %v1522_v36, %s1615_s16 }
 0x343   :  { %v297_v37 = vpop.permute.xlu1 %296 }
 0x344   :  { %v299_v38 = vmul.f32 %v1520_v30, %v297_v37 }
 0x346   :  { %301 = vrot.lane.b32.xlu1 %v299_v38, %s1616_s17 }
 0x3b8   :  { %v302_v39 = vpop.permute.xlu1 %301 }
 0x3b9   :  { %305 = vst.msk [vmem:[#allocation3] sm:$0x1] %vm304_vm3, %v302_v39  ;;  %1401 = vmatmul.mubr.msk.f32.vlgmr.msra.gmra.mrb[2].mxu1 %vm41_vm1, %v302_v39 }
 0x3ba   :  { %1483 = vmatpush3.bf16.msra.mxu1 %v1676_v12  ;;  %1414 = vmatprep.mubr.msk.f32.mxu1 %vm1611_vm0, %v1612_v1 }
 0x3bb   :  { %1487 = vmatprep.subr.bf16.mxu1 %v1610_v0 }
 0x48c   :  { %v377_v41 = vpop.f32.mrb[2].mxu1 }
 0x48d   :  { %v381_v42 = vadd.f32 %v377_v41, %v306_v40  ;;  %v1402_v43 = vpop.f32.mrb[3].mxu1 }
 0x48f   :  { %1523 = vtanh.f32 %v381_v42  ;;  %v1317_v45 = vmul.f32 -1.442695, %v381_v42 }
 0x491   :  { %1525 = vpow2.f32 %v1317_v45 }
 0x499   :  { %v1524_v44 = vpop.eup %1523 }
 0x49a   :  { %391 = vrot.lane.b32.xlu0 %v1524_v44, %s1613_s14 }
 0x49b   :  { %v1526_v46 = vpop.eup %1525 }
 0x49c   :  { %v385_v47 = vadd.f32 1.0, %v1526_v46 }
 0x49e   :  { %1527 = vrcp.f32 %v385_v47 }
 0x4a8   :  { %v1528_v48 = vpop.eup %1527 }
 0x4a9   :  { %v389_v51 = vmul.f32 %v1528_v48, %v293_v35 }
 0x50c   :  { %v392_v49 = vpop.permute.xlu0 %391 }
 0x50d   :  { %v394_v50 = vmul.f32 %v1528_v48, %v392_v49 }
 0x50f   :  { %396 = vrot.lane.b32.xlu1 %v394_v50, %s1614_s15 }
 0x581   :  { %v397_v52 = vpop.permute.xlu1 %396 }
 0x582   :  { %v399_v53 = vadd.f32 %v397_v52, %v389_v51  ;;  %v726_v51 = vld [vmem:[#allocation2 + $0x5] sm:$0x1] }
 0x584   :  { %1529 = vtanh.f32 %v399_v53 }
 0x58e   :  { %v1530_v54 = vpop.eup %1529 }
 0x58f   :  { %402 = vrot.lane.b32.xlu0 %v1530_v54, %s1615_s16 }
 0x601   :  { %v403_v55 = vpop.permute.xlu0 %402 }
 0x602   :  { %v405_v56 = vmul.f32 %v1528_v48, %v403_v55 }
 0x604   :  { %407 = vrot.lane.b32.xlu1 %v405_v56, %s1616_s17 }
 0x676   :  { %v408_v57 = vpop.permute.xlu1 %407 }
 0x677   :  { %410 = vst.msk [vmem:[#allocation3 + $0x1] sm:$0x1] %vm304_vm3, %v408_v57  ;;  %1408 = vmatmul.mubr.msk.f32.vlgmr.msra.gmra.mrb[4].mxu0 %vm41_vm1, %v408_v57 }
 0x678   :  { %1486 = vmatpush3.bf16.msra.mxu0 %v1676_v12  ;;  %1421 = vmatprep.mubr.msk.f32.mxu0 %vm1611_vm0, %v1612_v1 }
 0x679   :  { %1490 = vmatprep.subr.bf16.mxu0 %v1610_v0 }
 0x74a   :  { %v482_v59 = vpop.f32.mrb[4].mxu0 }
 0x74b   :  { %v486_v60 = vadd.f32 %v482_v59, %v411_v58  ;;  %v1409_v61 = vpop.f32.mrb[5].mxu0 }
 0x74d   :  { %1531 = vtanh.f32 %v486_v60  ;;  %v1319_v63 = vmul.f32 -1.442695, %v486_v60 }
 0x74f   :  { %1533 = vpow2.f32 %v1319_v63 }
 0x757   :  { %v1532_v62 = vpop.eup %1531 }
 0x758   :  { %496 = vrot.lane.b32.xlu0 %v1532_v62, %s1613_s14 }
 0x759   :  { %v1534_v2 = vpop.eup %1533 }
 0x75a   :  { %v490_v3 = vadd.f32 1.0, %v1534_v2 }
 0x75c   :  { %1535 = vrcp.f32 %v490_v3 }
 0x766   :  { %v1536_v4 = vpop.eup %1535 }
 0x767   :  { %v494_v7 = vmul.f32 %v1536_v4, %v399_v53 }
 0x7ca   :  { %v497_v5 = vpop.permute.xlu0 %496 }
 0x7cb   :  { %v499_v6 = vmul.f32 %v1536_v4, %v497_v5 }
 0x7cd   :  { %501 = vrot.lane.b32.xlu1 %v499_v6, %s1614_s15  ;;  %v831_v6 = vld [vmem:[#allocation2 + $0x6] sm:$0x1] }
 0x83f   :  { %v502_v8 = vpop.permute.xlu1 %501 }
 0x840   :  { %v504_v9 = vadd.f32 %v502_v8, %v494_v7 }
 0x842   :  { %1537 = vtanh.f32 %v504_v9 }
 0x84c   :  { %v1538_v10 = vpop.eup %1537 }
 0x84d   :  { %507 = vrot.lane.b32.xlu0 %v1538_v10, %s1615_s16 }
 0x8bf   :  { %v508_v11 = vpop.permute.xlu0 %507 }
 0x8c0   :  { %v510_v13 = vmul.f32 %v1536_v4, %v508_v11 }
 0x8c2   :  { %512 = vrot.lane.b32.xlu1 %v510_v13, %s1616_s17 }
 0x934   :  { %v513_v14 = vpop.permute.xlu1 %512 }
 0x935   :  { %515 = vst.msk [vmem:[#allocation3 + $0x2] sm:$0x1] %vm304_vm3, %v513_v14  ;;  %1415 = vmatmul.mubr.msk.f32.vlgmr.msra.gmra.mrb[4].mxu1 %vm41_vm1, %v513_v14 }
 0x936   :  { %1489 = vmatpush3.bf16.msra.mxu1 %v1676_v12  ;;  %1428 = vmatprep.mubr.msk.f32.mxu1 %vm1611_vm0, %v1612_v1 }
 0x937   :  { %1493 = vmatprep.subr.bf16.mxu1 %v1610_v0 }
 0xa08   :  { %v587_v16 = vpop.f32.mrb[4].mxu1 }
 0xa09   :  { %v591_v17 = vadd.f32 %v587_v16, %v516_v15  ;;  %v1416_v18 = vpop.f32.mrb[5].mxu1 }
 0xa0b   :  { %1539 = vtanh.f32 %v591_v17  ;;  %v1321_v20 = vmul.f32 -1.442695, %v591_v17 }
 0xa0d   :  { %1541 = vpow2.f32 %v1321_v20 }
 0xa15   :  { %v1540_v19 = vpop.eup %1539 }
 0xa16   :  { %601 = vrot.lane.b32.xlu0 %v1540_v19, %s1613_s14 }
 0xa17   :  { %v1542_v21 = vpop.eup %1541 }
 0xa18   :  { %v595_v22 = vadd.f32 1.0, %v1542_v21 }
 0xa1a   :  { %1543 = vrcp.f32 %v595_v22 }
 0xa24   :  { %v1544_v23 = vpop.eup %1543 }
 0xa25   :  { %v599_v26 = vmul.f32 %v1544_v23, %v504_v9 }
 0xa88   :  { %v602_v24 = vpop.permute.xlu0 %601 }
 0xa89   :  { %v604_v25 = vmul.f32 %v1544_v23, %v602_v24 }
 0xa8b   :  { %606 = vrot.lane.b32.xlu1 %v604_v25, %s1614_s15  ;;  %v936_v25 = vld [vmem:[#allocation2 + $0x7] sm:$0x1] }
 0xafd   :  { %v607_v27 = vpop.permute.xlu1 %606 }
 0xafe   :  { %v609_v28 = vadd.f32 %v607_v27, %v599_v26 }
 0xb00   :  { %1545 = vtanh.f32 %v609_v28 }
 0xb0a   :  { %v1546_v29 = vpop.eup %1545 }
 0xb0b   :  { %612 = vrot.lane.b32.xlu0 %v1546_v29, %s1615_s16 }
 0xb7d   :  { %v613_v30 = vpop.permute.xlu0 %612 }
 0xb7e   :  { %v615_v31 = vmul.f32 %v1544_v23, %v613_v30 }
 0xb80   :  { %617 = vrot.lane.b32.xlu1 %v615_v31, %s1616_s17 }
 0xbf2   :  { %v618_v32 = vpop.permute.xlu1 %617 }
 0xbf3   :  { %620 = vst.msk [vmem:[#allocation3 + $0x3] sm:$0x1] %vm304_vm3, %v618_v32  ;;  %1422 = vmatmul.mubr.msk.f32.vlgmr.msra.gmra.mrb[6].mxu0 %vm41_vm1, %v618_v32 }
 0xbf4   :  { %1492 = vmatpush3.bf16.msra.mxu0 %v1676_v12  ;;  %1435 = vmatprep.mubr.msk.f32.mxu0 %vm1611_vm0, %v1612_v1 }
 0xbf5   :  { %1496 = vmatprep.subr.bf16.mxu0 %v1610_v0 }
 0xcc6   :  { %v692_v34 = vpop.f32.mrb[6].mxu0 }
 0xcc7   :  { %v696_v35 = vadd.f32 %v692_v34, %v621_v33  ;;  %v1423_v36 = vpop.f32.mrb[7].mxu0 }
 0xcc9   :  { %1547 = vtanh.f32 %v696_v35  ;;  %v1323_v38 = vmul.f32 -1.442695, %v696_v35 }
 0xccb   :  { %1549 = vpow2.f32 %v1323_v38 }
 0xcd3   :  { %v1548_v37 = vpop.eup %1547 }
 0xcd4   :  { %706 = vrot.lane.b32.xlu0 %v1548_v37, %s1613_s14 }
 0xcd5   :  { %v1550_v39 = vpop.eup %1549 }
 0xcd6   :  { %v700_v40 = vadd.f32 1.0, %v1550_v39 }
 0xcd8   :  { %1551 = vrcp.f32 %v700_v40  ;;  %v1042_v40 = vld [vmem:[#allocation4 + $0x30] sm:$0xff] }
 0xce2   :  { %v1552_v41 = vpop.eup %1551 }
 0xce3   :  { %v704_v44 = vmul.f32 %v1552_v41, %v609_v28 }
 0xd46   :  { %v707_v42 = vpop.permute.xlu0 %706 }
 0xd47   :  { %v709_v43 = vmul.f32 %v1552_v41, %v707_v42 }
 0xd49   :  { %711 = vrot.lane.b32.xlu1 %v709_v43, %s1614_s15 }
 0xdbb   :  { %v712_v45 = vpop.permute.xlu1 %711 }
 0xdbc   :  { %v714_v46 = vadd.f32 %v712_v45, %v704_v44 }
 0xdbe   :  { %1553 = vtanh.f32 %v714_v46 }
 0xdc8   :  { %v1554_v47 = vpop.eup %1553 }
 0xdc9   :  { %717 = vrot.lane.b32.xlu0 %v1554_v47, %s1615_s16  ;;  %v1124_v47 = vld [vmem:[#allocation4 + $0x48] sm:$0xff] }
 0xe3b   :  { %v718_v48 = vpop.permute.xlu0 %717 }
 0xe3c   :  { %v720_v49 = vmul.f32 %v1552_v41, %v718_v48  ;;  %v1043_v41 = vld [vmem:[#allocation4 + $0x38] sm:$0xff] }
 0xe3d   :  { %v1497_v42 = vpack.c.bf16 %v1043_v41, %v1042_v40 }
 0xe3e   :  { %722 = vrot.lane.b32.xlu1 %v720_v49, %s1616_s17  ;;  %v1330_v49 = vld [vmem:[%s1802_s3 + $0x2] ss:$0 sm:$0xff] }
 0xeb0   :  { %v723_v50 = vpop.permute.xlu1 %722 }
 0xeb1   :  { %725 = vst.msk [vmem:[#allocation3 + $0x4] sm:$0x1] %vm304_vm3, %v723_v50  ;;  %1429 = vmatmul.mubr.msk.f32.vlgmr.msra.gmra.mrb[6].mxu1 %vm41_vm1, %v723_v50 }
 0xeb2   :  { %1495 = vmatpush3.bf16.msra.mxu1 %v1676_v12  ;;  %1442 = vmatprep.mubr.msk.f32.mxu1 %vm1611_vm0, %v1612_v1 }
 0xeb3   :  { %1499 = vmatprep.subr.bf16.mxu1 %v1610_v0 }
 0xf84   :  { %v797_v52 = vpop.f32.mrb[6].mxu1 }
 0xf85   :  { %v801_v53 = vadd.f32 %v797_v52, %v726_v51  ;;  %v1430_v54 = vpop.f32.mrb[7].mxu1 }
 0xf86   :  { %v1204_v54 = vld [vmem:[#allocation4 + $0x50] sm:$0xff] }
 0xf87   :  { %1555 = vtanh.f32 %v801_v53  ;;  %v1325_v56 = vmul.f32 -1.442695, %v801_v53 }
 0xf89   :  { %1557 = vpow2.f32 %v1325_v56 }
 0xf91   :  { %v1556_v55 = vpop.eup %1555 }
 0xf92   :  { %811 = vrot.lane.b32.xlu0 %v1556_v55, %s1613_s14  ;;  %v1205_v55 = vld [vmem:[#allocation4 + $0x58] sm:$0xff] }
 0xf93   :  { %v1558_v57 = vpop.eup %1557  ;;  %v1503_v56 = vpack.c.bf16 %v1205_v55, %v1204_v54 }
 0xf94   :  { %v805_v58 = vadd.f32 1.0, %v1558_v57 }
 0xf96   :  { %1559 = vrcp.f32 %v805_v58 }
 0xfa0   :  { %v1560_v59 = vpop.eup %1559 }
 0xfa1   :  { %v809_v61 = vmul.f32 %v1560_v59, %v714_v46 }
0x1004   :  { %v812_v12 = vpop.permute.xlu0 %811 }
0x1005   :  { %v814_v60 = vmul.f32 %v1560_v59, %v812_v12 }
0x1007   :  { %816 = vrot.lane.b32.xlu1 %v814_v60, %s1614_s15  ;;  %v1334_v60 = vld [vmem:[%s1802_s3 + $0x4] ss:$0 sm:$0xff] }
0x1079   :  { %v817_v62 = vpop.permute.xlu1 %816 }
0x107a   :  { %v819_v63 = vadd.f32 %v817_v62, %v809_v61 }
0x107c   :  { %1561 = vtanh.f32 %v819_v63 }
0x1086   :  { %v1562_v2 = vpop.eup %1561 }
0x1087   :  { %822 = vrot.lane.b32.xlu0 %v1562_v2, %s1615_s16 }
0x10f9   :  { %v823_v3 = vpop.permute.xlu0 %822 }
0x10fa   :  { %v825_v4 = vmul.f32 %v1560_v59, %v823_v3 }
0x10fc   :  { %827 = vrot.lane.b32.xlu1 %v825_v4, %s1616_s17 }
0x116e   :  { %v828_v5 = vpop.permute.xlu1 %827 }
0x116f   :  { %830 = vst.msk [vmem:[#allocation3 + $0x5] sm:$0x1] %vm304_vm3, %v828_v5  ;;  %1436 = vmatmul.mubr.msk.f32.vlgmr.msra.gmra.mrb[8].mxu0 %vm41_vm1, %v828_v5 }
0x1170   :  { %1449 = vmatprep.mubr.msk.f32.mxu0 %vm1611_vm0, %v1612_v1  ;;  %1498 = vmatpush3.bf16.msra.mxu0 %v1497_v42 }
0x1171   :  { %1502 = vmatprep.subr.bf16.mxu0 %v1610_v0  ;;  %v1123_v0 = vld [vmem:[#allocation4 + $0x40] sm:$0xff] }
0x1172   :  { %v1500_v48 = vpack.c.bf16 %v1124_v47, %v1123_v0 }
0x1242   :  { %v902_v7 = vpop.f32.mrb[8].mxu0 }
0x1243   :  { %v906_v8 = vadd.f32 %v902_v7, %v831_v6  ;;  %v1437_v9 = vpop.f32.mrb[9].mxu0 }
0x1245   :  { %1563 = vtanh.f32 %v906_v8  ;;  %v1327_v11 = vmul.f32 -1.442695, %v906_v8 }
0x1247   :  { %1565 = vpow2.f32 %v1327_v11 }
0x124f   :  { %v1564_v10 = vpop.eup %1563 }
0x1250   :  { %916 = vrot.lane.b32.xlu0 %v1564_v10, %s1613_s14 }
0x1251   :  { %v1566_v13 = vpop.eup %1565 }
0x1252   :  { %v910_v14 = vadd.f32 1.0, %v1566_v13 }
0x1254   :  { %1567 = vrcp.f32 %v910_v14 }
0x125e   :  { %v1568_v15 = vpop.eup %1567 }
0x125f   :  { %v914_v18 = vmul.f32 %v1568_v15, %v819_v63 }
0x12c2   :  { %v917_v16 = vpop.permute.xlu0 %916 }
0x12c3   :  { %v919_v17 = vmul.f32 %v1568_v15, %v917_v16 }
0x12c5   :  { %921 = vrot.lane.b32.xlu1 %v919_v17, %s1614_s15 }
0x1337   :  { %v922_v19 = vpop.permute.xlu1 %921 }
0x1338   :  { %v924_v20 = vadd.f32 %v922_v19, %v914_v18 }
0x133a   :  { %1569 = vtanh.f32 %v924_v20 }
0x1344   :  { %v1570_v21 = vpop.eup %1569 }
0x1345   :  { %927 = vrot.lane.b32.xlu0 %v1570_v21, %s1615_s16 }
0x13b7   :  { %v928_v22 = vpop.permute.xlu0 %927 }
0x13b8   :  { %v930_v23 = vmul.f32 %v1568_v15, %v928_v22 }
0x13ba   :  { %932 = vrot.lane.b32.xlu1 %v930_v23, %s1616_s17 }
0x142c   :  { %v933_v24 = vpop.permute.xlu1 %932 }
0x142d   :  { %935 = vst.msk [vmem:[#allocation3 + $0x6] sm:$0x1] %vm304_vm3, %v933_v24  ;;  %1443 = vmatmul.mubr.msk.f32.vlgmr.msra.gmra.mrb[8].mxu1 %vm41_vm1, %v933_v24 }
0x142e   :  { %1456 = vmatprep.mubr.msk.f32.mxu1 %vm1611_vm0, %v1612_v1  ;;  %1501 = vmatpush3.bf16.msra.mxu1 %v1500_v48 }
0x1500   :  { %v1007_v26 = vpop.f32.mrb[8].mxu1 }
0x1501   :  { %v1011_v27 = vadd.f32 %v1007_v26, %v936_v25  ;;  %v1444_v28 = vpop.f32.mrb[9].mxu1 }
0x1503   :  { %1571 = vtanh.f32 %v1011_v27  ;;  %v1329_v30 = vmul.f32 -1.442695, %v1011_v27 }
0x1505   :  { %1573 = vpow2.f32 %v1329_v30 }
0x150d   :  { %v1572_v29 = vpop.eup %1571 }
0x150e   :  { %1021 = vrot.lane.b32.xlu0 %v1572_v29, %s1613_s14 }
0x150f   :  { %v1574_v31 = vpop.eup %1573 }
0x1510   :  { %v1015_v32 = vadd.f32 1.0, %v1574_v31 }
0x1512   :  { %1575 = vrcp.f32 %v1015_v32 }
0x151c   :  { %v1576_v33 = vpop.eup %1575 }
0x151d   :  { %v1019_v36 = vmul.f32 %v1576_v33, %v924_v20 }
0x1580   :  { %v1022_v34 = vpop.permute.xlu0 %1021 }
0x1581   :  { %v1024_v35 = vmul.f32 %v1576_v33, %v1022_v34 }
0x1583   :  { %1026 = vrot.lane.b32.xlu1 %v1024_v35, %s1614_s15 }
0x15f5   :  { %v1027_v37 = vpop.permute.xlu1 %1026 }
0x15f6   :  { %v1029_v38 = vadd.f32 %v1027_v37, %v1019_v36 }
0x15f8   :  { %1577 = vtanh.f32 %v1029_v38 }
0x1602   :  { %v1578_v39 = vpop.eup %1577 }
0x1603   :  { %1032 = vrot.lane.b32.xlu0 %v1578_v39, %s1615_s16 }
0x1675   :  { %v1033_v43 = vpop.permute.xlu0 %1032 }
0x1676   :  { %v1035_v44 = vmul.f32 %v1576_v33, %v1033_v43 }
0x1678   :  { %1037 = vrot.lane.b32.xlu1 %v1035_v44, %s1616_s17 }
0x16ea   :  { %v1038_v45 = vpop.permute.xlu1 %1037 }
0x16eb   :  { %1040 = vst.msk [vmem:[#allocation3 + $0x7] sm:$0x1] %vm304_vm3, %v1038_v45  ;;  %1298 = vst.msk [vmem:[%s1804_s5] sm:$0x1] %vm304_vm3, %v1038_v45 }
0x16ec   :  { %1300 = vst.msk [vmem:[%s1804_s5] sm:$0x1] %vm1299_vm4, %v1029_v38 }
0x16f2   :  { %v1041_v46 = vld [vmem:[#allocation3] sm:$0xff] }
0x16f3   :  { %1450 = vmatmul.mubr.msk.f32.vlgmr.msra.gmra.mrb[10].mxu0 %vm41_vm1, %v1041_v46 }
0x16f4   :  { %1463 = vmatprep.mubr.msk.f32.mxu0 %vm1611_vm0, %v1612_v1  ;;  %1504 = vmatpush3.bf16.msra.mxu0 %v1503_v56  ;;  %v1332_v1 = vld [vmem:[%s1802_s3 + $0x3] ss:$0 sm:$0xff] }
0x17c6   :  { %v1118_v50 = vpop.f32.mrb[10].mxu0 }
0x17c7   :  { %v1119_v51 = vadd.f32 %v1330_v49, %v1118_v50  ;;  %v1451_v52 = vpop.f32.mrb[11].mxu0 }
0x17c9   :  { %v1122_v53 = vmax.f32 %v1119_v51, 0.0 }
0x17cb   :  { %1457 = vmatmul.mubr.msk.f32.vlgmr.msra.gmra.mrb[10].mxu1 %vm41_vm1, %v1122_v53 }
0x189e   :  { %v1199_v57 = vpop.f32.mrb[10].mxu1 }
0x189f   :  { %v1200_v58 = vadd.f32 %v1332_v1, %v1199_v57  ;;  %v1458_v59 = vpop.f32.mrb[11].mxu1 }
0x18a1   :  { %v1203_v12 = vmax.f32 %v1200_v58, 0.0 }
0x18a3   :  { %1464 = vmatmul.mubr.msk.f32.vlgmr.msra.gmra.mrb[12].mxu0 %vm41_vm1, %v1203_v12 }
0x1976   :  { %v1280_v61 = vpop.f32.mrb[12].mxu0 }
0x1977   :  { %v1281_v62 = vadd.f32 %v1334_v60, %v1280_v61  ;;  %v1465_v63 = vpop.f32.mrb[13].mxu0 }
0x1979   :  { %v1285_v2 = vsel %vm1284_vm5, %v1281_v62, -inf }
0x197a   :  { %1286 = vmax.xlane.f32.xlu0 %v1285_v2 }
0x1a07   :  { %v1287_v3 = vpop.xlane.xlu0 %1286 }
0x1a08   :  { %v1288_v4 = vsub.f32 %v1281_v62, %v1287_v3 }
0x1a0a   :  { %v1289_v5 = vmul.f32 1.442695, %v1288_v4 }
0x1a0c   :  { %1579 = vpow2.f32 %v1289_v5 }
0x1a16   :  { %v1580_v6 = vpop.eup %1579 }
0x1a17   :  { %v1291_v7 = vsel %vm1284_vm5, %v1580_v6, 0.0 }
0x1a18   :  { %1292 = vadd.xlane.f32.xlu1 %v1291_v7 }
0x1aa5   :  { %v1293_v8 = vpop.xlane.xlu1 %1292 }
0x1aa6   :  { %1581 = vrcp.f32 %v1293_v8 }
0x1ab0   :  { %v1582_v9 = vpop.eup %1581 }
0x1ab1   :  { %v1295_v10 = vmul.f32 %v1582_v9, %v1580_v6 }
0x1ab3   :  { %1296 = vst.msk [vmem:[%s1803_s4] sm:$0xff] %vm1284_vm5, %v1295_v10 }
0x1ab4   :  { %1309 = vsyncpa [#allocation5], 1 }

</bundles_post_ra>
